<compile_context>
chip_gen: v6e
topology: v6e:2x2x1
jax: 0.10.0
libtpu: 0.0.40
codegen_flags: <defaults>
</compile_context>

<pallas_src>
import jax
import jax.numpy as jnp
from jax.experimental import pallas as pl
from jax.experimental.pallas import tpu as pltpu


def _round8(n: int) -> int:
    return ((n + 7) // 8) * 8


# ---------------------------------------------------------------------------
# Parameter packing: one contiguous (rows, hidden) f32 buffer, 8-aligned rows.
#   [ W1 (S,H) | b1 (1,H) | W2 (H,H) | b2 (1,H) | w3^T (1,H) | b3 (1,H) ]
# ---------------------------------------------------------------------------
def pack_actor_params(params):
    w1, b1, w2, b2, w3, b3 = params
    S, H = w1.shape

    o_w1 = 0
    o_b1 = o_w1 + _round8(S)
    o_w2 = o_b1 + 8
    o_b2 = o_w2 + _round8(H)
    o_w3 = o_b2 + 8
    o_b3 = o_w3 + 8
    rows = o_b3 + 8

    packed = jnp.zeros((rows, H), jnp.float32)
    packed = packed.at[o_w1:o_w1 + S, :].set(w1)
    packed = packed.at[o_b1, :].set(b1.reshape(H))
    packed = packed.at[o_w2:o_w2 + H, :].set(w2)
    packed = packed.at[o_b2, :].set(b2.reshape(H))
    packed = packed.at[o_w3, :].set(w3.reshape(H))                # (H,1) -> row
    packed = packed.at[o_b3, :].set(jnp.broadcast_to(b3.reshape(()), (H,)))
    offs = (o_w1, o_b1, o_w2, o_b2, o_w3, o_b3)
    return packed, offs


# ---------------------------------------------------------------------------
# Kernel
# ---------------------------------------------------------------------------
def _make_actor_kernel(S, H, offs):
    o_w1, o_b1, o_w2, o_b2, o_w3, o_b3 = offs

    def kernel(x_ref, p_ref, o_ref):
        x = x_ref[...]                                   # (TB, S)

        # Static, sublane-aligned views into the single packed param buffer.
        w1 = p_ref[o_w1:o_w1 + S, :]                     # (S, H)
        b1 = p_ref[o_b1:o_b1 + 1, :]                     # (1, H)
        w2 = p_ref[o_w2:o_w2 + H, :]                     # (H, H)
        b2 = p_ref[o_b2:o_b2 + 1, :]                     # (1, H)
        w3 = p_ref[o_w3:o_w3 + 1, :]                     # (1, H) row vector
        b3 = p_ref[o_b3:o_b3 + 1, :]                     # (1, H) replicated

        # Layer 1: Linear + ReLU  (MXU matmul, VPU max)
        h1 = jnp.dot(x, w1, preferred_element_type=jnp.float32)
        h1 = jnp.maximum(h1 + b1, 0.0)

        # Layer 2: Linear + ReLU
        h2 = jnp.dot(h1, w2, preferred_element_type=jnp.float32)
        h2 = jnp.maximum(h2 + b2, 0.0)

        # Layer 3: hidden -> 1 as VPU multiply + lane reduction (avoids a
        # 1-column MXU matmul and its push/drain latency), then tanh (EUP).
        h3 = jnp.sum(h2 * w3, axis=-1, keepdims=True)    # (TB, 1)
        o_ref[...] = jnp.tanh(h3 + b3[:, :1])

    return kernel


# ---------------------------------------------------------------------------
# Wrapper
# ---------------------------------------------------------------------------
def actor_forward(mstate, packed, offs, *, block_b=None):
    """mstate: [B, 1, S] float32.  Returns [B, 1] float32."""
    x = jnp.squeeze(mstate, axis=-2)                     # [B, S]
    B, S = x.shape
    H = packed.shape[1]

    # Batch tile: whole batch for small B, otherwise 512-row tiles (f32
    # sublane multiple) so x / output double-buffer while the packed weights
    # stay VMEM-resident (constant index_map).  Sized well under v7x's
    # 32 MiB default scoped VMEM.
    if block_b is None:
        block_b = B if B <= 512 else 512
    n_blocks = pl.cdiv(B, block_b)
    Bp = n_blocks * block_b
    if Bp != B:
        x = jnp.pad(x, ((0, Bp - B), (0, 0)))

    kernel = _make_actor_kernel(S, H, offs)

    out = pl.pallas_call(
        kernel,
        out_shape=jax.ShapeDtypeStruct((Bp, 1), jnp.float32),
        grid=(n_blocks,),
        in_specs=[
            pl.BlockSpec((block_b, S), lambda i: (i, 0)),      # batch-tiled x
            pl.BlockSpec(packed.shape, lambda i: (0, 0)),      # resident params
        ],
        out_specs=pl.BlockSpec((block_b, 1), lambda i: (i, 0)),
        compiler_params=pltpu.CompilerParams(
            dimension_semantics=("parallel",)),                # 2 TCs on v7x
    )(x, packed)

    return out[:B]


# ---------------------------------------------------------------------------
# Init (PyTorch-style uniform +-1/sqrt(fan_in)) and pure-JAX reference
# ---------------------------------------------------------------------------
def init_actor_params(key, state_dim, hidden_dim):
    k1, k2, k3, k4, k5, k6 = jax.random.split(key, 6)

    def u(k, shape, fan_in):
        bound = 1.0 / jnp.sqrt(jnp.float32(fan_in))
        return jax.random.uniform(k, shape, jnp.float32, -bound, bound)

    w1 = u(k1, (state_dim, hidden_dim), state_dim)
    b1 = u(k2, (1, hidden_dim), state_dim)
    w2 = u(k3, (hidden_dim, hidden_dim), hidden_dim)
    b2 = u(k4, (1, hidden_dim), hidden_dim)
    w3 = u(k5, (hidden_dim, 1), hidden_dim)
    b3 = u(k6, (1, 1), hidden_dim)
    return (w1, b1, w2, b2, w3, b3)


def actor_reference(mstate, params):
    x = jnp.squeeze(mstate, axis=-2)
    w1, b1, w2, b2, w3, b3 = params
    h = jax.nn.relu(x @ w1 + b1)
    h = jax.nn.relu(h @ w2 + b2)
    return jnp.tanh(h @ w3 + b3)


if __name__ == "__main__":
    # Shapes consistent with the module: obs_shape_dict['Mstate'] = (1, 16)
    B, STATE_DIM, HIDDEN = 8, 16, 32

    key = jax.random.PRNGKey(0)
    k_params, k_obs = jax.random.split(key)

    params = init_actor_params(k_params, STATE_DIM, HIDDEN)
    packed, offs = pack_actor_params(params)
    mstate = jax.random.normal(k_obs, (B, 1, STATE_DIM), jnp.float32)

    out = actor_forward(mstate, packed, offs)
    out = jax.block_until_ready(out)

    ref = actor_reference(mstate, params)
    assert out.shape == (B, 1), out.shape
    assert jnp.allclose(out, ref, atol=1e-5, rtol=1e-5), (out, ref)

    print("KERNEL_OK")
</pallas_src>

<mosaic_0001>
module attributes {stable_mosaic.version = 11 : i64} {
  func.func @kernel(%arg0: i32, %arg1: memref<8x16xf32, #tpu.memory_space<vmem>>, %arg2: memref<80x32xf32, #tpu.memory_space<vmem>>, %arg3: memref<8x1xf32, #tpu.memory_space<vmem>>) attributes {dimension_semantics = [#tpu.dimension_semantics<parallel>], iteration_bounds = array<i64: 1>, scalar_prefetch = 0 : i64, scratch_operands = 0 : i64, tpu.core_type = #tpu.core_type<tc>, window_params = [{transform_indices = @transform_0, window_bounds = array<i64: 8, 16>}, {pipeline_mode = #tpu.pipeline_mode<synchronous>, transform_indices = @transform_1, window_bounds = array<i64: 80, 32>}, {transform_indices = @transform_2, window_bounds = array<i64: 8, 1>}]} {
    %c0 = arith.constant 0 : index
    %c0_0 = arith.constant 0 : index
    %0 = vector.load %arg1[%c0, %c0_0] : memref<8x16xf32, #tpu.memory_space<vmem>>, vector<8x16xf32>
    %c0_1 = arith.constant 0 : index
    %c0_2 = arith.constant 0 : index
    %1 = vector.load %arg2[%c0_1, %c0_2] : memref<80x32xf32, #tpu.memory_space<vmem>>, vector<16x32xf32>
    %c16 = arith.constant 16 : index
    %c0_3 = arith.constant 0 : index
    %2 = vector.load %arg2[%c16, %c0_3] : memref<80x32xf32, #tpu.memory_space<vmem>>, vector<1x32xf32>
    %c24 = arith.constant 24 : index
    %c0_4 = arith.constant 0 : index
    %3 = vector.load %arg2[%c24, %c0_4] : memref<80x32xf32, #tpu.memory_space<vmem>>, vector<32x32xf32>
    %c56 = arith.constant 56 : index
    %c0_5 = arith.constant 0 : index
    %4 = vector.load %arg2[%c56, %c0_5] : memref<80x32xf32, #tpu.memory_space<vmem>>, vector<1x32xf32>
    %c64 = arith.constant 64 : index
    %c0_6 = arith.constant 0 : index
    %5 = vector.load %arg2[%c64, %c0_6] : memref<80x32xf32, #tpu.memory_space<vmem>>, vector<1x32xf32>
    %c72 = arith.constant 72 : index
    %c0_7 = arith.constant 0 : index
    %6 = vector.load %arg2[%c72, %c0_7] : memref<80x32xf32, #tpu.memory_space<vmem>>, vector<1x32xf32>
    %cst = arith.constant dense<0.000000e+00> : vector<8x32xf32>
    %7 = tpu.matmul %0, %1, %cst {dimension_numbers = #tpu.dot_dimension_numbers<[1], [0], [0], [1], [0, 0, 1, 1], [], []>} : vector<8x16xf32>, vector<16x32xf32>, vector<8x32xf32> -> vector<8x32xf32>
    %8 = vector.broadcast %2 : vector<1x32xf32> to vector<8x32xf32>
    %9 = arith.addf %7, %8 : vector<8x32xf32>
    %cst_8 = arith.constant 0.000000e+00 : f32
    %10 = vector.broadcast %cst_8 : f32 to vector<8x32xf32>
    %11 = arith.maximumf %9, %10 : vector<8x32xf32>
    %cst_9 = arith.constant dense<0.000000e+00> : vector<8x32xf32>
    %12 = tpu.matmul %11, %3, %cst_9 {dimension_numbers = #tpu.dot_dimension_numbers<[1], [0], [0], [1], [0, 0, 1, 1], [], []>} : vector<8x32xf32>, vector<32x32xf32>, vector<8x32xf32> -> vector<8x32xf32>
    %13 = vector.broadcast %4 : vector<1x32xf32> to vector<8x32xf32>
    %14 = arith.addf %12, %13 : vector<8x32xf32>
    %cst_10 = arith.constant 0.000000e+00 : f32
    %15 = vector.broadcast %cst_10 : f32 to vector<8x32xf32>
    %16 = arith.maximumf %14, %15 : vector<8x32xf32>
    %17 = vector.broadcast %5 : vector<1x32xf32> to vector<8x32xf32>
    %18 = arith.mulf %16, %17 : vector<8x32xf32>
    %cst_11 = arith.constant dense<0.000000e+00> : vector<8xf32>
    %19 = vector.multi_reduction <add>, %18, %cst_11 [1] : vector<8x32xf32> to vector<8xf32>
    %20 = vector.shape_cast %19 : vector<8xf32> to vector<8x1xf32>
    %21 = vector.extract_strided_slice %6 {offsets = [0, 0], sizes = [1, 1], strides = [1, 1]} : vector<1x32xf32> to vector<1x1xf32>
    %22 = vector.broadcast %21 : vector<1x1xf32> to vector<8x1xf32>
    %23 = arith.addf %20, %22 : vector<8x1xf32>
    %24 = math.tanh %23 : vector<8x1xf32>
    %c0_12 = arith.constant 0 : index
    %c0_13 = arith.constant 0 : index
    %25 = vector.load %arg3[%c0_12, %c0_13] : memref<8x1xf32, #tpu.memory_space<vmem>>, vector<8x1xf32>
    tpu.vector_store %arg3[%c0_12, %c0_13], %24 {strides = array<i32>} : memref<8x1xf32, #tpu.memory_space<vmem>>, vector<8x1xf32>,
    return
  }
  func.func @transform_0(%arg0: i32) -> (i32, i32) {
    %c0_i32 = arith.constant 0 : i32
    %c0_i32_0 = arith.constant 0 : i32
    return %arg0, %c0_i32 : i32, i32
  }
  func.func @transform_1(%arg0: i32) -> (i32, i32) {
    %c0_i32 = arith.constant 0 : i32
    %c0_i32_0 = arith.constant 0 : i32
    %c0_i32_1 = arith.constant 0 : i32
    return %c0_i32, %c0_i32_0 : i32, i32
  }
  func.func @transform_2(%arg0: i32) -> (i32, i32) {
    %c0_i32 = arith.constant 0 : i32
    %c0_i32_0 = arith.constant 0 : i32
    return %arg0, %c0_i32 : i32, i32
  }
}

</mosaic_0001>

<bundles_post_ra>
// kernel: tpu_custom_call.1
= control target key start
LH: loop header
LB: loop body
LE: loop exit
PB: predicated region body
PF: predicated region fallthrough
CT: control target
= control target key end

     0   :  { %v236_v0 = vmov 0.0   ;;  %vm237_vm0 = vmmov 0   ;;  %vm26_vm1 = vcmask 130048   ;;  %vm105_vm2 = vcmask 261120   ;;  %s289_s1 = inlined_call_operand.vmem [shape: f32[80,32], index: 1, kind: input, shape index: {}]   ;;  %s290_s0 = inlined_call_operand.vmem [shape: f32[8,16], index: 0, kind: input, shape index: {}]   ;;  %s291_s2 = inlined_call_operand.vmem [shape: f32[8,1], index: 2, kind: output, shape index: {}]  }
   0x1   :  { %214 = vmatprep.subr.mxu0 %v236_v0  ;;  %v13_v1 = vld [vmem:[%s289_s1 + $0x8] sm:$0xff]  ;;  %v12_v2 = vld [vmem:[%s289_s1] sm:$0xff]  ;;  %218 = vmatprep.mubr.msk.f32.mxu0 %vm237_vm0, %v236_v0  ;;  %v18_v4 = vld [vmem:[%s289_s1 + $0x30] sm:$0xff]  ;;  %vm194_vm3 = vcmask 7168  }
   0x2   :  { %215 = vmatpush3.msra.mxu0 %v13_v1  ;;  %v11_v3 = vld [vmem:[%s290_s0] sm:$0xff]  ;;  %221 = vmatprep.subr.mxu1 %v236_v0  ;;  %v17_v5 = vld [vmem:[%s289_s1 + $0x28] sm:$0xff]  ;;  %v15_v7 = vld [vmem:[%s289_s1 + $0x18] sm:$0xff] }
   0x3   :  { %216 = vmatprep.subr.mxu0 %v236_v0  ;;  %222 = vmatpush3.msra.mxu1 %v18_v4  ;;  %v16_v6 = vld [vmem:[%s289_s1 + $0x20] sm:$0xff]  ;;  %v200_v8 = vld [vmem:[%s289_s1 + $0x10] ss:$0 sm:$0xff]  ;;  %v202_v13 = vld [vmem:[%s289_s1 + $0x38] ss:$0 sm:$0xff] }
   0x4   :  { %217 = vmatpush3.msra.mxu0 %v12_v2  ;;  %223 = vmatprep.subr.mxu1 %v236_v0  ;;  %v204_v17 = vld [vmem:[%s289_s1 + $0x40] ss:$0 sm:$0xff]  ;;  %v205_v21 = vld [vmem:[%s289_s1 + $0x48] ss:$0 sm:$0xff] }
   0x5   :  { %219 = vmatmul.mubr.msk.f32.vlgmr.msra.gmra.mxu0 %vm26_vm1, %v11_v3  ;;  %229 = vmatprep.mubr.msk.f32.mxu1 %vm237_vm0, %v236_v0 }
   0x6   :  { %224 = vmatpush3.msra.mxu1 %v17_v5 }
   0x7   :  { %225 = vmatprep.subr.mxu1 %v236_v0 }
   0x8   :  { %226 = vmatpush3.msra.mxu1 %v16_v6 }
   0x9   :  { %227 = vmatprep.subr.mxu1 %v236_v0 }
   0xa   :  { %228 = vmatpush3.msra.mxu1 %v15_v7 }
  0xc5   :  { %v96_v9 = vpop.f32.mrf.mxu0 }
  0xc6   :  { %v97_v10 = vadd.f32 %v200_v8, %v96_v9 }
  0xc7   :  { %v220_v11 = vpop.f32.mrf.mxu0 }
  0xc8   :  { %v100_v12 = vmax.f32 %v97_v10, 0.0 }
  0xca   :  { %230 = vmatmul.mubr.msk.f32.vlgmr.msra.gmra.mxu1 %vm105_vm2, %v100_v12 }
 0x18a   :  { %v175_v14 = vpop.f32.mrf.mxu1 }
 0x18b   :  { %v176_v15 = vadd.f32 %v202_v13, %v175_v14 }
 0x18c   :  { %v231_v16 = vpop.f32.mrf.mxu1 }
 0x18d   :  { %v179_v18 = vmax.f32 %v176_v15, 0.0 }
 0x18f   :  { %v184_v19 = vmul.f32 %v204_v17, %v179_v18 }
 0x191   :  { %v185_v20 = vsel %vm105_vm2, %v184_v19, 0.0 }
 0x192   :  { %186 = vadd.xlane.f32.xlu0 %v185_v20 }
 0x21b   :  { %v187_v22 = vpop.xlane.xlu0 %186 }
 0x21c   :  { %v192_v23 = vadd.f32 %v205_v21, %v187_v22 }
 0x21e   :  { %234 = vtanh.f32 %v192_v23 }
 0x22b   :  { %v235_v24 = vpop.eup %234 }
 0x22c   :  { %195 = vst.msk [vmem:[%s291_s2] sm:$0xff] %vm194_vm3, %v235_v24 }

</bundles_post_ra>
